<compile_context>
chip_gen: v7x
topology: tpu7x:2x2x1
jax: 0.10.0
libtpu: 0.0.40
codegen_flags: <defaults>
</compile_context>

<pallas_src>
import jax
import jax.numpy as jnp
from jax.experimental import pallas as pl
from jax.experimental.pallas import tpu as pltpu


# ---------------------------------------------------------------------------
# synthetic "args" and cell architecture (cell_arch is an input of the module)
# ---------------------------------------------------------------------------
class Args:
    nb_nodes = 2          # per-stage nodes; the cell has 3 * nb_nodes nodes
    conv_channels = 8
    leaky_slope = 0.2


NUM_MIXED_OPS = 3         # none / skip / linear  (stand-in Mixed op set)
BN_EPS = 1e-5


def build_cell_arch(total_nodes):
    """(src, dst, w, ops): every node dst receives an edge from node dst-1 and node 0."""
    arch = []
    w = 0
    for dst in range(1, total_nodes + 1):
        arch.append((dst - 1, dst, w, ("none", "skip", "linear")))
        w += 1
        if dst - 1 != 0:
            arch.append((0, dst, w, ("none", "skip", "linear")))
            w += 1
    return arch


# ---------------------------------------------------------------------------
# Pallas kernel:  out[b] = LeakyReLU( BN( M_total^T @ X[b] + c_total ) )
#   X layout is NCHW read directly as (B, C, S): channels on sublanes,
#   spatial on lanes (no transposes anywhere).
# ---------------------------------------------------------------------------
def make_cell_kernel(B, per_channel_count, leaky_slope, bn_eps):
    inv_count = 1.0 / float(per_channel_count)     # elements per channel = B * S

    def kernel(x_ref, m_ref, aff_ref, out_ref):
        m_t = m_ref[...]            # (C, C)  == M_total^T (transposed wrapper-side)
        c_col = aff_ref[0]          # (C, 1)  folded bias
        gamma = aff_ref[1]          # (C, 1)
        beta = aff_ref[2]           # (C, 1)

        # pre-BN activations: one MXU matmul per batch element (collapsed DAG)
        ys = []
        for b in range(B):
            ys.append(jnp.dot(m_t, x_ref[b],
                              preferred_element_type=jnp.float32) + c_col)

        # BatchNorm2d, training-mode batch statistics (biased variance),
        # per channel over (batch, spatial) == (python-unrolled batch, lane axis).
        s = ys[0]
        for y in ys[1:]:
            s = s + y
        mean = jnp.sum(s, axis=-1, keepdims=True) * inv_count        # (C, 1)
        sq = jnp.zeros_like(mean)
        for y in ys:
            d = y - mean
            sq = sq + jnp.sum(d * d, axis=-1, keepdims=True)
        var = sq * inv_count
        scale = gamma * jax.lax.rsqrt(var + bn_eps)                  # (C, 1)
        shift = beta - mean * scale

        # normalize + LeakyReLU, per batch element
        for b in range(B):
            yn = ys[b] * scale + shift
            out_ref[b] = jnp.where(yn > 0, yn, leaky_slope * yn)

    return kernel


# ---------------------------------------------------------------------------
# wrapper
# ---------------------------------------------------------------------------
def cell_forward(input_dict, weight, params, args, cell_arch):
    G, V = input_dict["G"], input_dict["V"]
    B, C, H, W = V.shape                     # NCHW (here W == 1)
    S = H * W                                # spatial size per batch element

    total_nodes = args.nb_nodes * 3
    concat_n = args.nb_nodes                 # == int(-total_nodes / 3) last states

    # ------------- static edge bookkeeping (Python-side) -------------
    link_dict = {}
    edge_index = {}
    for e_idx, (src, dst, w, _ops) in enumerate(cell_arch):
        link_dict.setdefault(dst, []).append((src, w))
        edge_index[(src, dst)] = e_idx

    # ------------- fold arch weights into effective edge affine maps -------------
    #   Mixed(x, a) = a_none*0 + a_skip*x + a_lin*(x @ W + b)
    #               = x @ (a_skip*I + a_lin*W) + a_lin*b
    ws = jnp.array([w for (_s, _d, w, _o) in cell_arch], dtype=jnp.int32)
    a_skip = weight[ws, 1][:, None, None]
    a_lin = weight[ws, 2][:, None, None]
    eye = jnp.eye(C, dtype=jnp.float32)
    W_eff = a_skip * eye[None] + a_lin * params["edge_w"]            # (E, C, C)
    b_eff = a_lin * params["edge_b"]                                 # (E, 1, C)

    # ------------- collapse the affine DAG + trans_concat_V wrapper-side -------------
    # state[dst] = V_in @ node_M[dst] + node_c[dst]   (row-vector convention)
    # Valid only because the Mixed stand-in is affine.
    node_M = [eye]
    node_c = [jnp.zeros((1, C), jnp.float32)]
    for dst in range(1, total_nodes + 1):
        M_acc = jnp.zeros((C, C), jnp.float32)
        c_acc = jnp.zeros((1, C), jnp.float32)
        for (src, _w) in link_dict[dst]:
            e = edge_index[(src, dst)]
            M_acc = M_acc + node_M[src] @ W_eff[e]
            c_acc = c_acc + node_c[src] @ W_eff[e] + b_eff[e]
        node_M.append(M_acc)
        node_c.append(c_acc)

    M_cat = jnp.concatenate(node_M[-concat_n:], axis=1)              # (C, concat_n*C)
    c_cat = jnp.concatenate(node_c[-concat_n:], axis=1)              # (1, concat_n*C)
    M_total = M_cat @ params["trans_w"]                              # (C, C)
    c_total = c_cat @ params["trans_w"] + params["trans_b"]          # (1, C)

    # kernel operands in the channel-on-sublane orientation
    m_t = jnp.asarray(M_total.T, jnp.float32)                        # (C, C)
    aff = jnp.stack([c_total.T,
                     params["gamma"].T,
                     params["beta"].T], axis=0).astype(jnp.float32)  # (3, C, 1)

    # NCHW read directly: (B, C, H, W) -> (B, C, S) is a pure reshape (no transpose)
    x = V.reshape(B, C, S).astype(jnp.float32)

    kernel = make_cell_kernel(B, B * S, args.leaky_slope, BN_EPS)
    vmem = pl.BlockSpec(memory_space=pltpu.MemorySpace.VMEM)
    out = pl.pallas_call(
        kernel,
        out_shape=jax.ShapeDtypeStruct((B, C, S), jnp.float32),
        in_specs=[vmem, vmem, vmem],
        out_specs=vmem,
    )(x, m_t, aff)

    V_out = out.reshape(B, C, H, W)                                  # no transpose
    return {"G": G, "V": V_out}


# ---------------------------------------------------------------------------
# pure-JAX reference of the UNcollapsed DAG (guards the affine collapse)
# ---------------------------------------------------------------------------
def reference_forward(V, weight, params, args, cell_arch):
    B, C, H, W = V.shape
    R = B * H * W
    v2d = jnp.transpose(V, (0, 2, 3, 1)).reshape(R, C).astype(jnp.float32)
    total_nodes = args.nb_nodes * 3
    concat_n = args.nb_nodes

    link_dict = {}
    edge_index = {}
    for e_idx, (src, dst, w, _ops) in enumerate(cell_arch):
        link_dict.setdefault(dst, []).append((src, w))
        edge_index[(src, dst)] = e_idx

    states = [v2d]
    for dst in range(1, total_nodes + 1):
        acc = jnp.zeros((R, C), jnp.float32)
        for (src, w) in link_dict[dst]:
            e = edge_index[(src, dst)]
            a = weight[w]
            lin = states[src] @ params["edge_w"][e] + params["edge_b"][e]
            acc = acc + a[1] * states[src] + a[2] * lin              # a[0] -> none (zero)
        states.append(acc)

    cat = jnp.concatenate(states[-concat_n:], axis=-1)
    y = cat @ params["trans_w"] + params["trans_b"]
    mean = jnp.mean(y, axis=0, keepdims=True)
    var = jnp.mean((y - mean) ** 2, axis=0, keepdims=True)
    y = (y - mean) * jax.lax.rsqrt(var + BN_EPS)
    y = y * params["gamma"] + params["beta"]
    y = jnp.where(y > 0, y, args.leaky_slope * y)
    return jnp.transpose(y.reshape(B, H, W, C), (0, 3, 1, 2))


# ---------------------------------------------------------------------------
# deterministic parameter construction
# ---------------------------------------------------------------------------
def init_params(key, args, cell_arch):
    C = args.conv_channels
    E = len(cell_arch)
    concat_n = args.nb_nodes
    k = jax.random.split(key, 6)
    params = {
        # per-edge "linear" op of the Mixed stand-in: 1x1 conv -> (Cin, Cout) matmul form
        "edge_w": (jax.random.normal(k[0], (E, C, C), jnp.float32) / jnp.sqrt(C)),
        "edge_b": 0.1 * jax.random.normal(k[1], (E, 1, C), jnp.float32),
        # trans_concat_V: Conv2d(nb_nodes*C -> C, kernel 1x1, bias=True), (Cin, Cout) form
        "trans_w": (jax.random.normal(k[2], (concat_n * C, C), jnp.float32)
                    / jnp.sqrt(concat_n * C)),
        "trans_b": 0.1 * jax.random.normal(k[3], (1, C), jnp.float32),
        # BatchNorm2d default init
        "gamma": jnp.ones((1, C), jnp.float32),
        "beta": jnp.zeros((1, C), jnp.float32),
    }
    # architecture weights: weight[w] is a length-NUM_MIXED_OPS simplex vector
    arch_logits = jax.random.normal(k[4], (E, NUM_MIXED_OPS), jnp.float32)
    arch_weight = jax.nn.softmax(arch_logits, axis=-1)
    return params, arch_weight


# ---------------------------------------------------------------------------
if __name__ == "__main__":
    # make the wrapper-side composition and the reference use full f32 matmuls
    jax.config.update("jax_default_matmul_precision", "highest")

    args = Args()
    total_nodes = args.nb_nodes * 3
    cell_arch = build_cell_arch(total_nodes)

    key = jax.random.PRNGKey(0)
    k_v, k_g, k_p = jax.random.split(key, 3)

    B, C, N = 2, args.conv_channels, 16
    V = jax.random.normal(k_v, (B, C, N, 1), jnp.float32)        # NCHW, W == 1
    G = jax.random.normal(k_g, (B, N, N), jnp.float32)           # graph, passed through

    params, arch_weight = init_params(k_p, args, cell_arch)

    out = cell_forward({"G": G, "V": V}, arch_weight, params, args, cell_arch)
    jax.block_until_ready(out["V"])

    assert out["V"].shape == (B, args.conv_channels, N, 1)
    assert out["G"].shape == G.shape

    # correctness guard: the collapsed-affine kernel must match the uncollapsed DAG
    ref = reference_forward(V, arch_weight, params, args, cell_arch)
    assert bool(jnp.allclose(out["V"], ref, rtol=2e-2, atol=2e-2)), \
        "kernel output does not match the uncollapsed reference"

    print("KERNEL_OK")
</pallas_src>

<mosaic_0001>
module attributes {stable_mosaic.version = 11 : i64} {
  func.func @kernel(%arg0: memref<2x8x16xf32, #tpu.memory_space<vmem>>, %arg1: memref<8x8xf32, #tpu.memory_space<vmem>>, %arg2: memref<3x8x1xf32, #tpu.memory_space<vmem>>, %arg3: memref<2x8x16xf32, #tpu.memory_space<vmem>>) attributes {dimension_semantics = [], scalar_prefetch = 0 : i64, scratch_operands = 0 : i64, tpu.core_type = #tpu.core_type<tc>} {
    %c0 = arith.constant 0 : index
    %c0_0 = arith.constant 0 : index
    %0 = vector.load %arg1[%c0, %c0_0] : memref<8x8xf32, #tpu.memory_space<vmem>>, vector<8x8xf32>
    %c0_1 = arith.constant 0 : index
    %c0_2 = arith.constant 0 : index
    %c0_3 = arith.constant 0 : index
    %1 = vector.load %arg2[%c0_1, %c0_2, %c0_3] : memref<3x8x1xf32, #tpu.memory_space<vmem>>, vector<1x8x1xf32>
    %2 = vector.shape_cast %1 : vector<1x8x1xf32> to vector<8x1xf32>
    %c1 = arith.constant 1 : index
    %c0_4 = arith.constant 0 : index
    %c0_5 = arith.constant 0 : index
    %3 = vector.load %arg2[%c1, %c0_4, %c0_5] : memref<3x8x1xf32, #tpu.memory_space<vmem>>, vector<1x8x1xf32>
    %4 = vector.shape_cast %3 : vector<1x8x1xf32> to vector<8x1xf32>
    %c2 = arith.constant 2 : index
    %c0_6 = arith.constant 0 : index
    %c0_7 = arith.constant 0 : index
    %5 = vector.load %arg2[%c2, %c0_6, %c0_7] : memref<3x8x1xf32, #tpu.memory_space<vmem>>, vector<1x8x1xf32>
    %6 = vector.shape_cast %5 : vector<1x8x1xf32> to vector<8x1xf32>
    %c0_8 = arith.constant 0 : index
    %c0_9 = arith.constant 0 : index
    %c0_10 = arith.constant 0 : index
    %7 = vector.load %arg0[%c0_8, %c0_9, %c0_10] : memref<2x8x16xf32, #tpu.memory_space<vmem>>, vector<1x8x16xf32>
    %8 = vector.shape_cast %7 : vector<1x8x16xf32> to vector<8x16xf32>
    %cst = arith.constant dense<0.000000e+00> : vector<8x16xf32>
    %9 = tpu.matmul %0, %8, %cst {dimension_numbers = #tpu.dot_dimension_numbers<[1], [0], [0], [1], [0, 0, 1, 1], [], []>, precision = #tpu.contract_precision<fp32>} : vector<8x8xf32>, vector<8x16xf32>, vector<8x16xf32> -> vector<8x16xf32>
    %10 = vector.broadcast %2 : vector<8x1xf32> to vector<8x16xf32>
    %11 = arith.addf %9, %10 : vector<8x16xf32>
    %c1_11 = arith.constant 1 : index
    %c0_12 = arith.constant 0 : index
    %c0_13 = arith.constant 0 : index
    %12 = vector.load %arg0[%c1_11, %c0_12, %c0_13] : memref<2x8x16xf32, #tpu.memory_space<vmem>>, vector<1x8x16xf32>
    %13 = vector.shape_cast %12 : vector<1x8x16xf32> to vector<8x16xf32>
    %cst_14 = arith.constant dense<0.000000e+00> : vector<8x16xf32>
    %14 = tpu.matmul %0, %13, %cst_14 {dimension_numbers = #tpu.dot_dimension_numbers<[1], [0], [0], [1], [0, 0, 1, 1], [], []>, precision = #tpu.contract_precision<fp32>} : vector<8x8xf32>, vector<8x16xf32>, vector<8x16xf32> -> vector<8x16xf32>
    %15 = vector.broadcast %2 : vector<8x1xf32> to vector<8x16xf32>
    %16 = arith.addf %14, %15 : vector<8x16xf32>
    %17 = arith.addf %11, %16 : vector<8x16xf32>
    %cst_15 = arith.constant dense<0.000000e+00> : vector<8xf32>
    %18 = vector.multi_reduction <add>, %17, %cst_15 [1] : vector<8x16xf32> to vector<8xf32>
    %19 = vector.shape_cast %18 : vector<8xf32> to vector<8x1xf32>
    %cst_16 = arith.constant 3.125000e-02 : f32
    %20 = vector.broadcast %cst_16 : f32 to vector<8x1xf32>
    %21 = arith.mulf %19, %20 : vector<8x1xf32>
    %cst_17 = arith.constant 0.000000e+00 : f32
    %22 = vector.broadcast %cst_17 : f32 to vector<8x1xf32>
    %23 = vector.broadcast %21 : vector<8x1xf32> to vector<8x16xf32>
    %24 = arith.subf %11, %23 : vector<8x16xf32>
    %25 = arith.mulf %24, %24 : vector<8x16xf32>
    %cst_18 = arith.constant dense<0.000000e+00> : vector<8xf32>
    %26 = vector.multi_reduction <add>, %25, %cst_18 [1] : vector<8x16xf32> to vector<8xf32>
    %27 = vector.shape_cast %26 : vector<8xf32> to vector<8x1xf32>
    %28 = arith.addf %22, %27 : vector<8x1xf32>
    %29 = vector.broadcast %21 : vector<8x1xf32> to vector<8x16xf32>
    %30 = arith.subf %16, %29 : vector<8x16xf32>
    %31 = arith.mulf %30, %30 : vector<8x16xf32>
    %cst_19 = arith.constant dense<0.000000e+00> : vector<8xf32>
    %32 = vector.multi_reduction <add>, %31, %cst_19 [1] : vector<8x16xf32> to vector<8xf32>
    %33 = vector.shape_cast %32 : vector<8xf32> to vector<8x1xf32>
    %34 = arith.addf %28, %33 : vector<8x1xf32>
    %cst_20 = arith.constant 3.125000e-02 : f32
    %35 = vector.broadcast %cst_20 : f32 to vector<8x1xf32>
    %36 = arith.mulf %34, %35 : vector<8x1xf32>
    %cst_21 = arith.constant 9.99999974E-6 : f32
    %37 = vector.broadcast %cst_21 : f32 to vector<8x1xf32>
    %38 = arith.addf %36, %37 : vector<8x1xf32>
    %39 = math.rsqrt %38 : vector<8x1xf32>
    %40 = arith.mulf %4, %39 : vector<8x1xf32>
    %41 = arith.mulf %21, %40 : vector<8x1xf32>
    %42 = arith.subf %6, %41 : vector<8x1xf32>
    %43 = vector.broadcast %40 : vector<8x1xf32> to vector<8x16xf32>
    %44 = arith.mulf %11, %43 : vector<8x16xf32>
    %45 = vector.broadcast %42 : vector<8x1xf32> to vector<8x16xf32>
    %46 = arith.addf %44, %45 : vector<8x16xf32>
    %cst_22 = arith.constant 0.000000e+00 : f32
    %47 = vector.broadcast %cst_22 : f32 to vector<8x16xf32>
    %48 = arith.cmpf ogt, %46, %47 : vector<8x16xf32>
    %cst_23 = arith.constant 2.000000e-01 : f32
    %49 = vector.broadcast %cst_23 : f32 to vector<8x16xf32>
    %50 = arith.mulf %49, %46 : vector<8x16xf32>
    %51 = arith.select %48, %46, %50 : vector<8x16xi1>, vector<8x16xf32>
    %c0_24 = arith.constant 0 : index
    %c0_25 = arith.constant 0 : index
    %c0_26 = arith.constant 0 : index
    %52 = vector.load %arg3[%c0_24, %c0_25, %c0_26] : memref<2x8x16xf32, #tpu.memory_space<vmem>>, vector<1x8x16xf32>
    %53 = vector.shape_cast %52 : vector<1x8x16xf32> to vector<8x16xf32>
    %54 = vector.shape_cast %51 : vector<8x16xf32> to vector<1x8x16xf32>
    tpu.vector_store %arg3[%c0_24, %c0_25, %c0_26], %54 {strides = array<i32>} : memref<2x8x16xf32, #tpu.memory_space<vmem>>, vector<1x8x16xf32>,
    %55 = vector.broadcast %40 : vector<8x1xf32> to vector<8x16xf32>
    %56 = arith.mulf %16, %55 : vector<8x16xf32>
    %57 = vector.broadcast %42 : vector<8x1xf32> to vector<8x16xf32>
    %58 = arith.addf %56, %57 : vector<8x16xf32>
    %cst_27 = arith.constant 0.000000e+00 : f32
    %59 = vector.broadcast %cst_27 : f32 to vector<8x16xf32>
    %60 = arith.cmpf ogt, %58, %59 : vector<8x16xf32>
    %cst_28 = arith.constant 2.000000e-01 : f32
    %61 = vector.broadcast %cst_28 : f32 to vector<8x16xf32>
    %62 = arith.mulf %61, %58 : vector<8x16xf32>
    %63 = arith.select %60, %58, %62 : vector<8x16xi1>, vector<8x16xf32>
    %c1_29 = arith.constant 1 : index
    %c0_30 = arith.constant 0 : index
    %c0_31 = arith.constant 0 : index
    %64 = vector.load %arg3[%c1_29, %c0_30, %c0_31] : memref<2x8x16xf32, #tpu.memory_space<vmem>>, vector<1x8x16xf32>
    %65 = vector.shape_cast %64 : vector<1x8x16xf32> to vector<8x16xf32>
    %66 = vector.shape_cast %63 : vector<8x16xf32> to vector<1x8x16xf32>
    tpu.vector_store %arg3[%c1_29, %c0_30, %c0_31], %66 {strides = array<i32>} : memref<2x8x16xf32, #tpu.memory_space<vmem>>, vector<1x8x16xf32>,
    return
  }
}

</mosaic_0001>

<bundles_post_ra>
// kernel: tpu_custom_call.1
= control target key start
LH: loop header
LB: loop body
LE: loop exit
PB: predicated region body
PF: predicated region fallthrough
CT: control target
= control target key end

     0   :  { %vm27_vm0 = vcmask 64512   ;;  %v1131_v3 = vmov 0.0   ;;  %vm1132_vm1 = vmmov 0   ;;  %s1228_s0 = inlined_call_operand.vmem [shape: f32[2,8,16], index: 0, kind: input, shape index: {}]   ;;  %s1229_s1 = inlined_call_operand.vmem [shape: f32[8,8], index: 1, kind: input, shape index: {}]   ;;  %s1230_s2 = inlined_call_operand.vmem [shape: f32[3,8,1], index: 2, kind: input, shape index: {}]   ;;  %s1231_s3 = inlined_call_operand.hbm [shape: f32[2,8,16], index: 3, kind: output, shape index: {}]  }
   0x1   :  { %v21_v0 = vld [vmem:[%s1228_s0] sm:$0xff]  ;;  %v990_v1 = vld [vmem:[%s1228_s0 + $0x8] sm:$0xff]  ;;  %1015 = vmatprep.subr.mxu0 %v1131_v3  ;;  %1045 = vmatprep.subr.mxu1 %v1131_v3 }
   0x2   :  { %v15_v2 = vld [vmem:[%s1229_s1] sm:$0xff]  ;;  %v32_v4 = vand.u32 4294901760, %v21_v0  ;;  %v480_v5 = vand.u32 4294901760, %v990_v1  ;;  %1017 = vmatprep.mubr.msk.f32.mxu0 %vm1132_vm1, %v1131_v3  ;;  %1047 = vmatprep.mubr.msk.f32.mxu1 %vm1132_vm1, %v1131_v3 }
   0x3   :  { %v29_v6 = vsel %vm27_vm0, %v15_v2, 0 }
   0x4   :  { %v97_v7 = vand.u32 4294901760, %v29_v6 }
   0x5   :  { %8 = vsyncpa [#allocation3], 0  ;;  %1016 = vmatpush3.msra.mxu0 %v32_v4  ;;  %v109_v8 = vsub.f32 %v21_v0, %v32_v4  ;;  %1046 = vmatpush3.msra.mxu1 %v480_v5  ;;  %v557_v9 = vsub.f32 %v990_v1, %v480_v5  ;;  %v16_v10 = vld [vmem:[%s1230_s2] sm:$0xff]  ;;  %v1133_v14 = vmov 0   ;;  %vm926_vm2 = vcmask 130048   ;;  %v988_v44 = vld [vmem:[%s1230_s2 + $0x8] sm:$0xff] }
   0x6   :  { %1020 = vmatprep.subr.mxu0 %v1131_v3  ;;  %1050 = vmatprep.subr.mxu1 %v1131_v3  ;;  %v98_v11 = vsub.f32 %v29_v6, %v97_v7  ;;  %v989_v47 = vld [vmem:[%s1230_s2 + $0x10] sm:$0xff]  ;;  %s1134_s22 = smov [#allocation2]  }
   0x7   :  { %v110_v12 = vand.u32 4294901760, %v109_v8  ;;  %v558_v13 = vand.u32 4294901760, %v557_v9  ;;  %1103 = vset.pattern.permute.xlu0 %v1133_v14  ;;  %1104 = vset.pattern.permute.xlu1 %v1133_v14  ;;  %s977_s23 = sshll.u32 %s1134_s22, 4  ;;  %s978_s23 = int_to_ptr.vmem [resolvable:$true] %s977_s23 }
   0x8   :  { %v99_v15 = vand.u32 4294901760, %v98_v11  ;;  %24 = vperm.xlu0 %1103, %v16_v10   ;;  %s1107_s2 = scalar_lea.vmem %s978_s23, 256  ;;  %p1112_p1 = scmp.lt.s32.totalorder %s978_s23, %s978_s23 }
   0x9   :  { %v111_v16 = vsub.f32 %v109_v8, %v110_v12  ;;  %v559_v17 = vsub.f32 %v557_v9, %v558_v13  ;;  %p1108_p0 = scmp.ne.s32.totalorder %s978_s23, %s1107_s2  ;;  %p1113_p2 = scmp.lt.s32.totalorder %s1107_s2, %s1107_s2 }
   0xa   :  { %v100_v18 = vsub.f32 %v98_v11, %v99_v15 }
   0xb   :  { %v112_v19 = vand.u32 4294901760, %v111_v16  ;;  %v560_v20 = vand.u32 4294901760, %v559_v17  ;;  %p1114_p3 = por %p1113_p2, %p1112_p1 }
   0xc   :  { %v101_v21 = vand.u32 4294901760, %v100_v18 }
   0xd   :  { %p1115_p4 = pnand %p1114_p3, %p1108_p0 }
   0xe   :  { %1018 = vmatmul.mubr.f32.vlgmr.msra.gmra.mrb[0].mxu0 %v101_v21  ;;  %1048 = vmatmul.mubr.f32.vlgmr.msra.gmra.mrb[0].mxu1 %v101_v21 }
   0xf   :  { %1021 = vmatpush3.msra.mxu0 %v112_v19  ;;  %1051 = vmatpush3.msra.mxu1 %v560_v20 }
  0x10   :  { %1022 = vmatprep.mubr.msk.f32.mxu0 %vm1132_vm1, %v1131_v3  ;;  %1025 = vmatprep.subr.mxu0 %v1131_v3 }
  0x11   :  { %1052 = vmatprep.mubr.msk.f32.mxu1 %vm1132_vm1, %v1131_v3  ;;  %1055 = vmatprep.subr.mxu1 %v1131_v3 }
  0x16   :  { %1023 = vmatmul.mubr.f32.vlgmr.msra.gmra.mrb[0].mxu0 %v97_v7  ;;  %1053 = vmatmul.mubr.f32.vlgmr.msra.gmra.mrb[0].mxu1 %v97_v7 }
  0x17   :  { %1026 = vmatpush3.msra.mxu0 %v109_v8  ;;  %1056 = vmatpush3.msra.mxu1 %v557_v9 }
  0x18   :  { %1027 = vmatprep.mubr.msk.f32.mxu0 %vm1132_vm1, %v1131_v3  ;;  %1030 = vmatprep.subr.mxu0 %v1131_v3 }
  0x19   :  { %1057 = vmatprep.mubr.msk.f32.mxu1 %vm1132_vm1, %v1131_v3  ;;  %1060 = vmatprep.subr.mxu1 %v1131_v3 }
  0x1e   :  { %1028 = vmatmul.mubr.f32.vlgmr.msra.gmra.mrb[0].mxu0 %v98_v11  ;;  %1058 = vmatmul.mubr.f32.vlgmr.msra.gmra.mrb[0].mxu1 %v98_v11 }
  0x1f   :  { %1031 = vmatpush3.msra.mxu0 %v32_v4  ;;  %1061 = vmatpush3.msra.mxu1 %v480_v5 }
  0x20   :  { %1032 = vmatprep.mubr.msk.f32.mxu0 %vm1132_vm1, %v1131_v3  ;;  %1035 = vmatprep.subr.mxu0 %v1131_v3 }
  0x21   :  { %1062 = vmatprep.mubr.msk.f32.mxu1 %vm1132_vm1, %v1131_v3  ;;  %1065 = vmatprep.subr.mxu1 %v1131_v3 }
  0x26   :  { %1033 = vmatmul.mubr.f32.vlgmr.msra.gmra.mrb[0].mxu0 %v99_v15  ;;  %1063 = vmatmul.mubr.f32.vlgmr.msra.gmra.mrb[0].mxu1 %v99_v15 }
  0x27   :  { %1036 = vmatpush3.msra.mxu0 %v110_v12  ;;  %1066 = vmatpush3.msra.mxu1 %v558_v13 }
  0x28   :  { %1037 = vmatprep.mubr.msk.f32.mxu0 %vm1132_vm1, %v1131_v3  ;;  %1040 = vmatprep.subr.mxu0 %v1131_v3 }
  0x29   :  { %1067 = vmatprep.mubr.msk.f32.mxu1 %vm1132_vm1, %v1131_v3  ;;  %1070 = vmatprep.subr.mxu1 %v1131_v3 }
  0x2e   :  { %1038 = vmatmul.mubr.f32.vlgmr.msra.gmra.mrb[0].mxu0 %v97_v7  ;;  %1068 = vmatmul.mubr.f32.vlgmr.msra.gmra.mrb[0].mxu1 %v97_v7 }
  0x2f   :  { %1041 = vmatpush3.msra.mxu0 %v32_v4  ;;  %1071 = vmatpush3.msra.mxu1 %v480_v5 }
  0x30   :  { %1042 = vmatprep.mubr.msk.f32.mxu0 %vm1132_vm1, %v1131_v3  ;;  %1072 = vmatprep.mubr.msk.f32.mxu1 %vm1132_vm1, %v1131_v3 }
  0x36   :  { %1043 = vmatmul.mubr.f32.vlgmr.msra.gmra.mrb[0].mxu0 %v97_v7  ;;  %1073 = vmatmul.mubr.f32.vlgmr.msra.gmra.mrb[0].mxu1 %v97_v7 }
  0x87   :  { %v25_v22 = vpop.permute.xlu0 %24 }
 0x109   :  { %v473_v23 = vpop.f32.mrb[0].mxu0  ;;  %v921_v24 = vpop.f32.mrb[0].mxu1 }
 0x10a   :  { %v1075_v25 = vadd.f32 %v473_v23, %v25_v22  ;;  %v1076_v26 = vadd.f32 %v921_v24, %v25_v22  ;;  %v1044_v27 = vpop.f32.mrb[1].mxu0  ;;  %v1074_v28 = vpop.f32.mrb[1].mxu1 }
 0x10c   :  { %v925_v29 = vadd.f32 %v1076_v26, %v1075_v25 }
 0x10e   :  { %v927_v30 = vsel %vm926_vm2, %v925_v29, 0.0 }
 0x10f   :  { %928 = vadd.xlane.f32.xlu0 %v927_v30 }
 0x19c   :  { %v929_v31 = vpop.xlane.xlu0 %928 }
 0x19d   :  { %v930_v32 = vmul.f32 0.03125, %v929_v31 }
 0x19f   :  { %v931_v33 = vsub.f32 %v1075_v25, %v930_v32  ;;  %v937_v34 = vsub.f32 %v1076_v26, %v930_v32 }
 0x1a1   :  { %v932_v35 = vmul.f32 %v931_v33, %v931_v33  ;;  %v938_v37 = vmul.f32 %v937_v34, %v937_v34 }
 0x1a3   :  { %v933_v36 = vsel %vm926_vm2, %v932_v35, 0.0  ;;  %v939_v38 = vsel %vm926_vm2, %v938_v37, 0.0 }
 0x1a4   :  { %934 = vadd.xlane.f32.xlu1 %v933_v36 }
 0x1a8   :  { %940 = vadd.xlane.f32.xlu1 %v939_v38 }
 0x231   :  { %v935_v39 = vpop.xlane.xlu1 %934 }
 0x235   :  { %v941_v40 = vpop.xlane.xlu1 %940 }
 0x236   :  { %v942_v41 = vadd.f32 %v941_v40, %v935_v39 }
 0x238   :  { %v943_v42 = vmul.f32 0.03125, %v942_v41 }
 0x23a   :  { %v944_v43 = vadd.f32 1e-05, %v943_v42 }
 0x23c   :  { %1105 = vrsqrt.f32 %v944_v43 }
 0x246   :  { %v1106_v45 = vpop.eup %1105 }
 0x247   :  { %v946_v46 = vmul.f32 %v1106_v45, %v988_v44 }
 0x249   :  { %951 = vperm.xlu1 %1104, %v946_v46   ;;  %v947_v48 = vmul.f32 %v946_v46, %v930_v32 }
 0x24b   :  { %v948_v49 = vsub.f32 %v989_v47, %v947_v48 }
 0x24d   :  { %957 = vperm.xlu1 %1104, %v948_v49  }
 0x2c8   :  { %v952_v50 = vpop.permute.xlu1 %951 }
 0x2c9   :  { %v954_v51 = vmul.f32 %v1075_v25, %v952_v50  ;;  %v965_v52 = vmul.f32 %v1076_v26, %v952_v50 }
 0x2cc   :  { %v958_v53 = vpop.permute.xlu1 %957 }
 0x2cd   :  { %v960_v54 = vadd.f32 %v958_v53, %v954_v51  ;;  %v966_v55 = vadd.f32 %v965_v52, %v958_v53 }
 0x2cf   :  { %vm961_vm3 = vcmp.gt.f32.partialorder %v960_v54, 0.0  ;;  %v962_v56 = vmul.f32 0.2, %v960_v54  ;;  %vm967_vm4 = vcmp.gt.f32.partialorder %v966_v55, 0.0  ;;  %v968_v57 = vmul.f32 0.2, %v966_v55 }
 0x2d1   :  { %v963_v58 = vsel %vm961_vm3, %v960_v54, %v962_v56  ;;  %v969_v59 = vsel %vm967_vm4, %v966_v55, %v968_v57 }
 0x2d2   :  { %964 = vst.msk [vmem:[#allocation2] sm:$0xff] %vm926_vm2, %v963_v58  ;;  %971 = vst.msk [vmem:[#allocation2 + $0x8] sm:$0xff] %vm926_vm2, %v969_v59 }
 0x2d3   :  { %1118 = shalt.err (!%p1115_p4)
}
 0x2d4   :  { %s1119_s26 = scalar_lea.hbm %s1231_s3, 256 }
 0x2d5   :  { %p1120_p5 = scmp.ne.s32.totalorder %s1231_s3, %s1119_s26  ;;  %p1123_p6 = scmp.lt.u32.totalorder %s1119_s26, %s1231_s3 }
 0x2d7   :  { %p1125_p7 = pnand %p1123_p6, %p1120_p5 }
 0x2d9   :  { %1128 = shalt.err (!%p1125_p7)
}
 0x2da   :  { %s1135_s4 = smov 128   ;;  %s1136_s5 = smov 8  }
 0x2db   :  { %983 = dma.vmem_to_hbm [thread:$0]  %s978_s23, 256, %s1231_s3, [#allocation3], %s1135_s4, %s1135_s4, %s1136_s5  }
 0x2dc   :  { %1129 = dma.done.wait [#allocation3], 256  }
 0x2dd   :  { %1130 = vsyncadd [#allocation3], 4294967040 }
 0x2de   :  { %987 = vsyncpa [#allocation3], 1 }

</bundles_post_ra>
